<compile_context>
chip_gen: v6e
topology: v6e:2x2x1
jax: 0.10.0
libtpu: 0.0.40
codegen_flags: <defaults>
</compile_context>

<pallas_src>
import jax
import jax.numpy as jnp
import numpy as np
from jax.experimental import pallas as pl
from jax.experimental.pallas import tpu as pltpu


def adapter_kernel(x_ref, w_ref, b_ref, o_ref):
    """One (tm, H) tile of tokens: out = x + relu(x @ W) + bias."""
    x = x_ref[...]                                                    # (tm, H)
    y = jnp.dot(x, w_ref[...], preferred_element_type=jnp.float32)    # MXU, f32 acc
    y = jnp.maximum(y, 0.0) + b_ref[...]                              # relu + bias (VPU)
    o_ref[...] = (x.astype(jnp.float32) + y).astype(o_ref.dtype)      # residual


def make_kronecker_weight(A, B_mat):
    """Materialize kron(B, A) -> (H, H). Hoist out of the per-call hot path."""
    r0, r1 = A.shape
    p, q = B_mat.shape
    # kron(B, A)[i1*r0 + i2, j1*r1 + j2] = B[i1, j1] * A[i2, j2]
    return (B_mat[:, None, :, None] * A[None, :, None, :]).reshape(p * r0, q * r1)


def kronecker_adapter_apply(x, W, bias, *, tm=4096):
    """x: (batch, seq, H), W: (H, H) precomputed kron(B, A), bias: (H,)."""
    Bdim, S, H = x.shape
    M = Bdim * S
    x2 = x.reshape(M, H)

    # Balanced row tile: spread M over ceil(M/tm) grid steps, rounded up to a
    # sublane multiple. No wrapper-side padding: Pallas masks the ragged tail.
    n_chunks = max(1, -(-M // tm))                 # ceil(M / tm)
    tm_eff = -(-M // n_chunks)                     # ceil(M / n_chunks)
    tm_eff = ((tm_eff + 7) // 8) * 8               # sublane multiple
    tm_eff = max(8, min(tm_eff, ((M + 7) // 8) * 8))
    grid_m = pl.cdiv(M, tm_eff)

    W2 = W.astype(x.dtype)                         # MXU takes bf16/f32 natively
    bias2 = bias.reshape(1, H).astype(jnp.float32)

    xbytes = jnp.dtype(x.dtype).itemsize
    cost = pl.CostEstimate(
        flops=2 * M * H * H,
        bytes_accessed=2 * M * H * xbytes + H * H * xbytes + H * 4,
        transcendentals=0,
    )

    # Double-buffered x & out tiles + resident W/bias. Only raise the scoped
    # VMEM limit when an explicitly large tm would overflow the v5e default.
    vmem_needed = 2 * 2 * tm_eff * H * xbytes + 2 * H * H * xbytes + 4 * H * 4
    cp_kwargs = dict(dimension_semantics=("parallel",))   # v7x: shard rows over 2 TCs
    if vmem_needed > 14 * 1024 * 1024:
        cp_kwargs["vmem_limit_bytes"] = min(int(vmem_needed * 1.25), 64 * 1024 * 1024)

    out = pl.pallas_call(
        adapter_kernel,
        out_shape=jax.ShapeDtypeStruct((M, H), x.dtype),
        grid_spec=pltpu.PrefetchScalarGridSpec(
            num_scalar_prefetch=0,
            grid=(grid_m,),
            in_specs=[
                pl.BlockSpec((tm_eff, H), lambda i: (i, 0)),   # x row tile
                pl.BlockSpec((H, H), lambda i: (0, 0)),        # resident Kronecker weight
                pl.BlockSpec((1, H), lambda i: (0, 0)),        # resident bias row
            ],
            out_specs=pl.BlockSpec((tm_eff, H), lambda i: (i, 0)),
        ),
        compiler_params=pltpu.CompilerParams(**cp_kwargs),
        cost_estimate=cost,
    )(x2, W2, bias2)

    return out.reshape(Bdim, S, H)


def kronecker_adapter(x, A, B_mat, bias, *, tm=4096):
    """Convenience wrapper: expands kron(B, A) then applies the adapter."""
    W = make_kronecker_weight(A, B_mat)
    return kronecker_adapter_apply(x, W, bias, tm=tm)


def _reference(x, A, B_mat, bias):
    H = x.shape[-1]
    W_ref = jnp.kron(B_mat.astype(jnp.float32), A.astype(jnp.float32))
    xf = x.reshape(-1, H).astype(jnp.float32)
    rep = jnp.maximum(xf @ W_ref, 0.0) + bias.astype(jnp.float32)
    return (xf + rep).reshape(x.shape)


if __name__ == "__main__":
    # Small shapes consistent with the module: hidden size 128, r = [8, 16]
    # so A:(8,16), B:(16,8), kron:(128,128); tokens = batch 2 x seq 8.
    H = 128
    r = [8, 16]
    batch, seq = 2, 8

    key = jax.random.PRNGKey(0)
    kx, kA, kB = jax.random.split(key, 3)

    x = jax.random.normal(kx, (batch, seq, H), dtype=jnp.float32)
    # Deterministic synthetic parameters (module init would zero B / bias; use
    # non-trivial values so the compute path is actually exercised).
    A = 0.02 * jax.random.normal(kA, (r[0], r[1]), dtype=jnp.float32)
    B_mat = 0.02 * jax.random.normal(kB, (H // r[0], H // r[1]), dtype=jnp.float32)
    bias = jnp.zeros((H,), dtype=jnp.float32)   # kronecker_bias init: zeros

    # Precompute the Kronecker weight once (per-layer) outside the hot path.
    W = make_kronecker_weight(A, B_mat)
    apply_fn = jax.jit(kronecker_adapter_apply, static_argnames=("tm",))

    # 1) Small f32 case (M = 16, single tile).
    out = jax.block_until_ready(apply_fn(x, W, bias))
    ref = _reference(x, A, B_mat, bias)
    np.testing.assert_allclose(np.asarray(out), np.asarray(ref), rtol=1e-5, atol=1e-5)

    # 2) Ragged M across multiple tiles (M = 3*333 = 999, tm=256 -> 4 balanced
    #    256-row tiles, last one masked) — exercises the no-pad tail path.
    x_big = jax.random.normal(kx, (3, 333, H), dtype=jnp.float32)
    out_big = jax.block_until_ready(apply_fn(x_big, W, bias, tm=256))
    ref_big = _reference(x_big, A, B_mat, bias)
    np.testing.assert_allclose(np.asarray(out_big), np.asarray(ref_big),
                               rtol=1e-5, atol=1e-5)

    # 3) bf16 activations end-to-end (halves HBM traffic on the hot path).
    x_bf = x_big.astype(jnp.bfloat16)
    W_bf = W.astype(jnp.bfloat16)
    out_bf = jax.block_until_ready(apply_fn(x_bf, W_bf, bias))
    ref_bf = _reference(x_bf, A.astype(jnp.bfloat16), B_mat.astype(jnp.bfloat16), bias)
    np.testing.assert_allclose(np.asarray(out_bf, dtype=np.float32),
                               np.asarray(ref_bf), rtol=3e-2, atol=3e-2)

    print("KERNEL_OK")
</pallas_src>

<mosaic_0001>
module attributes {stable_mosaic.version = 11 : i64} {
  func.func @adapter_kernel(%arg0: i32, %arg1: memref<16x128xf32, #tpu.memory_space<vmem>>, %arg2: memref<128x128xf32, #tpu.memory_space<vmem>>, %arg3: memref<1x128xf32, #tpu.memory_space<vmem>>, %arg4: memref<16x128xf32, #tpu.memory_space<vmem>>) attributes {dimension_semantics = [#tpu.dimension_semantics<parallel>], iteration_bounds = array<i64: 1>, scalar_prefetch = 0 : i64, scratch_operands = 0 : i64, tpu.core_type = #tpu.core_type<tc>, window_params = [{transform_indices = @transform_0, window_bounds = array<i64: 16, 128>}, {pipeline_mode = #tpu.pipeline_mode<synchronous>, transform_indices = @transform_1, window_bounds = array<i64: 128, 128>}, {pipeline_mode = #tpu.pipeline_mode<synchronous>, transform_indices = @transform_2, window_bounds = array<i64: 1, 128>}, {transform_indices = @transform_3, window_bounds = array<i64: 16, 128>}]} {
    %c0 = arith.constant 0 : index
    %c0_0 = arith.constant 0 : index
    %0 = vector.load %arg1[%c0, %c0_0] : memref<16x128xf32, #tpu.memory_space<vmem>>, vector<16x128xf32>
    %c0_1 = arith.constant 0 : index
    %c0_2 = arith.constant 0 : index
    %1 = vector.load %arg2[%c0_1, %c0_2] : memref<128x128xf32, #tpu.memory_space<vmem>>, vector<128x128xf32>
    %cst = arith.constant dense<0.000000e+00> : vector<16x128xf32>
    %2 = tpu.matmul %0, %1, %cst {dimension_numbers = #tpu.dot_dimension_numbers<[1], [0], [0], [1], [0, 0, 1, 1], [], []>} : vector<16x128xf32>, vector<128x128xf32>, vector<16x128xf32> -> vector<16x128xf32>
    %cst_3 = arith.constant 0.000000e+00 : f32
    %3 = vector.broadcast %cst_3 : f32 to vector<16x128xf32>
    %4 = arith.maximumf %2, %3 : vector<16x128xf32>
    %c0_4 = arith.constant 0 : index
    %c0_5 = arith.constant 0 : index
    %5 = vector.load %arg3[%c0_4, %c0_5] : memref<1x128xf32, #tpu.memory_space<vmem>>, vector<1x128xf32>
    %6 = vector.broadcast %5 : vector<1x128xf32> to vector<16x128xf32>
    %7 = arith.addf %4, %6 : vector<16x128xf32>
    %8 = arith.addf %0, %7 : vector<16x128xf32>
    %c0_6 = arith.constant 0 : index
    %c0_7 = arith.constant 0 : index
    %9 = vector.load %arg4[%c0_6, %c0_7] : memref<16x128xf32, #tpu.memory_space<vmem>>, vector<16x128xf32>
    tpu.vector_store %arg4[%c0_6, %c0_7], %8 {strides = array<i32>} : memref<16x128xf32, #tpu.memory_space<vmem>>, vector<16x128xf32>,
    return
  }
  func.func @transform_0(%arg0: i32) -> (i32, i32) {
    %c0_i32 = arith.constant 0 : i32
    %c0_i32_0 = arith.constant 0 : i32
    return %arg0, %c0_i32 : i32, i32
  }
  func.func @transform_1(%arg0: i32) -> (i32, i32) {
    %c0_i32 = arith.constant 0 : i32
    %c0_i32_0 = arith.constant 0 : i32
    %c0_i32_1 = arith.constant 0 : i32
    return %c0_i32, %c0_i32_0 : i32, i32
  }
  func.func @transform_2(%arg0: i32) -> (i32, i32) {
    %c0_i32 = arith.constant 0 : i32
    %c0_i32_0 = arith.constant 0 : i32
    %c0_i32_1 = arith.constant 0 : i32
    return %c0_i32, %c0_i32_0 : i32, i32
  }
  func.func @transform_3(%arg0: i32) -> (i32, i32) {
    %c0_i32 = arith.constant 0 : i32
    %c0_i32_0 = arith.constant 0 : i32
    return %arg0, %c0_i32 : i32, i32
  }
}

</mosaic_0001>

<bundles_post_ra>
// kernel: kronecker_adapter_apply.1
= control target key start
LH: loop header
LB: loop body
LE: loop exit
PB: predicated region body
PF: predicated region fallthrough
CT: control target
= control target key end

     0   :  { %8 = vsyncpa [#allocation3], 0  ;;  %s340_s0 = inlined_call_operand.hbm [shape: f32[16,128], index: 0, kind: input, shape index: {}]   ;;  %s341_s1 = inlined_call_operand.hbm [shape: f32[128,128], index: 1, kind: input, shape index: {}]   ;;  %s342_s2 = inlined_call_operand.vmem [shape: f32[1,128], index: 2, kind: input, shape index: {}]   ;;  %s343_s3 = inlined_call_operand.hbm [shape: f32[16,128], index: 3, kind: output, shape index: {}]  }
   0x1   :  { %9 = vsyncpa [#allocation6], 0 }
   0x2   :  { %10 = vsyncpa [#allocation4], 0  ;;  %s294_s12 = smov [#allocation2]  }
   0x3   :  { %s16_s13 = sshll.u32 %s294_s12, 4  ;;  %s17_s13 = int_to_ptr.vmem [resolvable:$true] %s16_s13 }
   0x4   :  { %s236_s14 = scalar_lea.vmem %s17_s13, 256  ;;  %p241_p1 = scmp.lt.s32.totalorder %s17_s13, %s17_s13 }
   0x5   :  { %p237_p0 = scmp.ne.s32.totalorder %s17_s13, %s236_s14  ;;  %p242_p2 = scmp.lt.s32.totalorder %s236_s14, %s236_s14 }
   0x7   :  { %p243_p3 = por %p242_p2, %p241_p1 }
   0x9   :  { %p244_p4 = pnand %p243_p3, %p237_p0 }
   0xb   :  { %247 = shalt.err (!%p244_p4)
}
   0xc   :  { %s295_s15 = smov 128   ;;  %s296_s16 = smov 8  }
   0xd   :  { %22 = dma.hbm_to_vmem [thread:$0]  %s340_s0, 256, %s17_s13, [#allocation3], %s295_s15, %s295_s15, %s296_s16  }
   0xe   :  { %s297_s19 = smov [#allocation5]  }
   0xf   :  { %s28_s20 = sshll.u32 %s297_s19, 4  ;;  %s29_s20 = int_to_ptr.vmem [resolvable:$true] %s28_s20 }
  0x10   :  { %s256_s21 = scalar_lea.vmem %s29_s20, 2048  ;;  %p261_p6 = scmp.lt.s32.totalorder %s29_s20, %s29_s20 }
  0x11   :  { %p257_p5 = scmp.ne.s32.totalorder %s29_s20, %s256_s21  ;;  %p262_p7 = scmp.lt.s32.totalorder %s256_s21, %s256_s21 }
  0x13   :  { %p263_p8 = por %p262_p7, %p261_p6 }
  0x15   :  { %p264_p9 = pnand %p263_p8, %p257_p5 }
  0x17   :  { %267 = shalt.err (!%p264_p9)
}
  0x18   :  { %34 = dma.hbm_to_vmem [thread:$0]  %s341_s1, 2048, %s29_s20, [#allocation6], %s295_s15, %s295_s15, %s296_s16  }
  0x19   :  { %288 = dma.done.wait [#allocation3], 256  }
  0x1a   :  { %289 = vsyncadd [#allocation3], 4294967040 }
  0x1b   :  { %290 = dma.done.wait [#allocation6], 2048  }
  0x1c   :  { %291 = vsyncadd [#allocation6], 4294965248  ;;  %v60_v0 = vld [vmem:[#allocation5 + $0x78] sm:$0xff]  ;;  %v59_v1 = vld [vmem:[#allocation5 + $0x70] sm:$0xff]  ;;  %s298_s24 = smov [#allocation7]  }
  0x1d   :  { %188 = vmatprep.subr.mxu0 %v60_v0  ;;  %v58_v2 = vld [vmem:[#allocation5 + $0x68] sm:$0xff]  ;;  %v57_v3 = vld [vmem:[#allocation5 + $0x60] sm:$0xff]  ;;  %v43_v4 = vld [vmem:[#allocation2] sm:$0xff]  ;;  %s156_s25 = sshll.u32 %s298_s24, 4  ;;  %s157_s25 = int_to_ptr.vmem [resolvable:$true] %s156_s25 }
  0x1e   :  { %189 = vmatpush3.msra.mxu0 %v60_v0  ;;  %v56_v5 = vld [vmem:[#allocation5 + $0x58] sm:$0xff]  ;;  %220 = vmatprep.mubr.f32.mxu0 %v43_v4  ;;  %v55_v6 = vld [vmem:[#allocation5 + $0x50] sm:$0xff]  ;;  %v54_v7 = vld [vmem:[#allocation5 + $0x48] sm:$0xff]  ;;  %s268_s26 = scalar_lea.vmem %s157_s25, 256  ;;  %p273_p11 = scmp.lt.s32.totalorder %s157_s25, %s157_s25 }
  0x1f   :  { %190 = vmatprep.subr.mxu0 %v59_v1  ;;  %v53_v8 = vld [vmem:[#allocation5 + $0x40] sm:$0xff]  ;;  %v52_v9 = vld [vmem:[#allocation5 + $0x38] sm:$0xff]  ;;  %v51_v10 = vld [vmem:[#allocation5 + $0x30] sm:$0xff]  ;;  %p269_p10 = scmp.ne.s32.totalorder %s157_s25, %s268_s26  ;;  %p274_p12 = scmp.lt.s32.totalorder %s268_s26, %s268_s26 }
  0x20   :  { %191 = vmatpush3.msra.mxu0 %v59_v1  ;;  %v50_v11 = vld [vmem:[#allocation5 + $0x28] sm:$0xff]  ;;  %v49_v12 = vld [vmem:[#allocation5 + $0x20] sm:$0xff]  ;;  %v48_v13 = vld [vmem:[#allocation5 + $0x18] sm:$0xff] }
  0x21   :  { %192 = vmatprep.subr.mxu0 %v58_v2  ;;  %v47_v14 = vld [vmem:[#allocation5 + $0x10] sm:$0xff]  ;;  %v46_v15 = vld [vmem:[#allocation5 + $0x8] sm:$0xff]  ;;  %v45_v16 = vld [vmem:[#allocation5] sm:$0xff]  ;;  %p275_p13 = por %p274_p12, %p273_p11 }
  0x22   :  { %193 = vmatpush3.msra.mxu0 %v58_v2  ;;  %v44_v17 = vld [vmem:[#allocation2 + $0x8] sm:$0xff]  ;;  %v169_v19 = vld [vmem:[%s342_s2] ss:$0 sm:$0xff] }
  0x23   :  { %194 = vmatprep.subr.mxu0 %v57_v3  ;;  %p276_p0 = pnand %p275_p13, %p269_p10 }
  0x24   :  { %195 = vmatpush3.msra.mxu0 %v57_v3 }
  0x25   :  { %196 = vmatprep.subr.mxu0 %v56_v5 }
  0x26   :  { %197 = vmatpush3.msra.mxu0 %v56_v5 }
  0x27   :  { %198 = vmatprep.subr.mxu0 %v55_v6 }
  0x28   :  { %199 = vmatpush3.msra.mxu0 %v55_v6 }
  0x29   :  { %200 = vmatprep.subr.mxu0 %v54_v7 }
  0x2a   :  { %201 = vmatpush3.msra.mxu0 %v54_v7 }
  0x2b   :  { %202 = vmatprep.subr.mxu0 %v53_v8 }
  0x2c   :  { %203 = vmatpush3.msra.mxu0 %v53_v8 }
  0x2d   :  { %204 = vmatprep.subr.mxu0 %v52_v9 }
  0x2e   :  { %205 = vmatpush3.msra.mxu0 %v52_v9 }
  0x2f   :  { %206 = vmatprep.subr.mxu0 %v51_v10 }
  0x30   :  { %207 = vmatpush3.msra.mxu0 %v51_v10 }
  0x31   :  { %208 = vmatprep.subr.mxu0 %v50_v11 }
  0x32   :  { %209 = vmatpush3.msra.mxu0 %v50_v11 }
  0x33   :  { %210 = vmatprep.subr.mxu0 %v49_v12 }
  0x34   :  { %211 = vmatpush3.msra.mxu0 %v49_v12 }
  0x35   :  { %212 = vmatprep.subr.mxu0 %v48_v13 }
  0x36   :  { %213 = vmatpush3.msra.mxu0 %v48_v13 }
  0x37   :  { %214 = vmatprep.subr.mxu0 %v47_v14 }
  0x38   :  { %215 = vmatpush3.msra.mxu0 %v47_v14 }
  0x39   :  { %216 = vmatprep.subr.mxu0 %v46_v15 }
  0x3a   :  { %217 = vmatpush3.msra.mxu0 %v46_v15 }
  0x3b   :  { %218 = vmatprep.subr.mxu0 %v45_v16 }
  0x3c   :  { %219 = vmatpush3.msra.mxu0 %v45_v16 }
  0x3d   :  { %221 = vmatmul.mubr.f32.vlgmr.msra.gmra.mxu0 %v44_v17 }
  0xfd   :  { %v222_v18 = vpop.f32.mrf.mxu0 }
  0xfe   :  { %v137_v20 = vmax.f32 %v222_v18, 0.0 }
  0xff   :  { %v127_v21 = vpop.f32.mrf.mxu0 }
 0x100   :  { %v146_v22 = vadd.f32 %v169_v19, %v137_v20  ;;  %v136_v23 = vmax.f32 %v127_v21, 0.0 }
 0x102   :  { %v148_v24 = vadd.f32 %v146_v22, %v44_v17  ;;  %v145_v25 = vadd.f32 %v169_v19, %v136_v23 }
 0x104   :  { %150 = vst [vmem:[#allocation7 + $0x8] sm:$0xff] %v148_v24  ;;  %v147_v26 = vadd.f32 %v145_v25, %v43_v4 }
 0x106   :  { %149 = vst [vmem:[#allocation7] sm:$0xff] %v147_v26 }
 0x107   :  { %279 = shalt.err (!%p276_p0)
}
 0x108   :  { %162 = dma.vmem_to_hbm [thread:$0]  %s157_s25, 256, %s343_s3, [#allocation4], %s295_s15, %s295_s15, %s296_s16  }
 0x109   :  { %292 = dma.done.wait [#allocation4], 256  }
 0x10a   :  { %293 = vsyncadd [#allocation4], 4294967040 }
 0x10b   :  { %166 = vsyncpa [#allocation3], 1 }
 0x10c   :  { %167 = vsyncpa [#allocation6], 1 }
 0x10d   :  { %168 = vsyncpa [#allocation4], 1 }

</bundles_post_ra>
